<compile_context>
chip_gen: v5e
topology: v5e:2x2
jax: 0.10.0
libtpu: 0.0.40
codegen_flags: <defaults>
</compile_context>

<pallas_src>
import functools

import jax
import jax.numpy as jnp
from jax.experimental import pallas as pl
from jax.experimental.pallas import tpu as pltpu


def _conv1x1_kernel(w_ref, x_ref, o_ref):
    # Full K per tile: exactly one MXU pass, result stored straight to the output
    # block (no accumulator scratch, no init/finalize pl.when path, no extra vst).
    o_ref[...] = jnp.dot(
        w_ref[...], x_ref[...], preferred_element_type=jnp.float32
    ).astype(o_ref.dtype)


@functools.partial(jax.jit, static_argnames=("tco", "ts"))
def _conv1x1_matmul(w2d, x_cs, *, tco, ts):
    """(C_out, C_in) weight x (N, C_in, S) activations -> (N, C_out, S)."""
    c_out, c_in = w2d.shape
    n, c_in2, s = x_cs.shape
    assert c_in == c_in2, (c_in, c_in2)
    assert c_out % tco == 0 and s % ts == 0, (c_out, tco, s, ts)

    return pl.pallas_call(
        _conv1x1_kernel,
        out_shape=jax.ShapeDtypeStruct((n, c_out, s), x_cs.dtype),
        grid_spec=pltpu.PrefetchScalarGridSpec(
            num_scalar_prefetch=0,
            grid=(n, c_out // tco, s // ts),
            in_specs=[
                # Weight tile (GEMM LHS): only re-fetched when the C_out tile changes.
                pl.BlockSpec((tco, c_in), lambda b, j, si: (j, 0)),
                # Activations (GEMM RHS): full C_in resident; block index does not
                # depend on j, so it is not re-DMA'd across C_out tiles.
                pl.BlockSpec((None, c_in, ts), lambda b, j, si: (b, 0, si)),
            ],
            out_specs=pl.BlockSpec((None, tco, ts), lambda b, j, si: (b, j, si)),
        ),
        compiler_params=pltpu.CompilerParams(
            # All axes independent; >=2 steps on the C_out axis keeps both v7x
            # TensorCores busy (v5e/v6e are single-TC and unaffected).
            dimension_semantics=("parallel", "parallel", "parallel"),
            # Allow XLA to fuse the stride-2 slice / reshape producer chain into
            # the activation operand instead of materializing it in HBM.
            allow_input_fusion=[False, True],
        ),
    )(w2d, x_cs)


def _pick_spatial_tile(s):
    """Spatial tiling: a single full-S block when it fits VMEM comfortably
    (no padding, no post-slice); otherwise pad S up to a 1024-wide tile."""
    if s <= 2048:
        return s, s
    ts = 1024
    return ts, pl.cdiv(s, ts) * ts


def conv2d_1x1_stride2(x_nchw, weight):
    """Equivalent of nn.Conv2d(C_in, C_out, kernel_size=1, stride=2, bias=False).

    x_nchw: (N, C_in, H, W)
    weight: (C_out, C_in) or (C_out, C_in, 1, 1)
    returns (N, C_out, ceil(H/2), ceil(W/2))  in NCHW
    """
    n, c_in, h, w = x_nchw.shape
    c_out = weight.shape[0]
    w2d = weight.reshape(c_out, c_in)
    assert c_out % 128 == 0 and c_in % 128 == 0, (c_out, c_in)

    h_out, w_out = (h + 1) // 2, (w + 1) // 2
    s = h_out * w_out

    # NCHW-direct: the only wrapper-side layout work is the stride-2 subsample
    # (the reshape after it is contiguous, i.e. free).  No NHWC transposes.
    x_cs = x_nchw[:, :, ::2, ::2].reshape(n, c_in, s)

    ts, s_pad = _pick_spatial_tile(s)
    if s_pad != s:
        x_cs = jnp.pad(x_cs, ((0, 0), (0, 0), (0, s_pad - s)))

    # >= 2 C_out tiles whenever possible (v7x megacore load balance).
    tco = 256 if (c_out % 256 == 0 and c_out >= 512) else 128

    # TODO(synk): if numerics permit, cast x_cs / w2d to bfloat16 here (keeping the
    # f32 accumulate inside the kernel) to halve the dominant HBM streams.
    out = _conv1x1_matmul(w2d, x_cs, tco=tco, ts=ts)        # (N, C_out, S_pad)
    if s_pad != s:
        out = out[:, :, :s]
    return out.reshape(n, c_out, h_out, w_out)


if __name__ == "__main__":
    key = jax.random.PRNGKey(0)
    kx, kw = jax.random.split(key)

    # Channels fixed by the module (256 -> 512); spatial/batch kept small.
    N, C_IN, H, W = 2, 256, 16, 16
    C_OUT = 512

    x = jax.random.normal(kx, (N, C_IN, H, W), dtype=jnp.float32)
    wgt = jax.random.normal(kw, (C_OUT, C_IN), dtype=jnp.float32) * (1.0 / jnp.sqrt(C_IN))

    out = conv2d_1x1_stride2(x, wgt)
    out = jax.block_until_ready(out)

    ref = jnp.einsum("nchw,oc->nohw", x[:, :, ::2, ::2], wgt,
                     precision=jax.lax.Precision.HIGHEST)
    assert out.shape == (N, C_OUT, (H + 1) // 2, (W + 1) // 2), out.shape
    assert jnp.allclose(out, ref, atol=1e-4, rtol=1e-4), float(jnp.max(jnp.abs(out - ref)))

    # Odd-spatial case exercises the ceil(H/2) semantics of a stride-2 / kernel-1 conv.
    x_odd = jax.random.normal(kx, (1, C_IN, 15, 15), dtype=jnp.float32)
    out_odd = jax.block_until_ready(conv2d_1x1_stride2(x_odd, wgt))
    ref_odd = jnp.einsum("nchw,oc->nohw", x_odd[:, :, ::2, ::2], wgt,
                         precision=jax.lax.Precision.HIGHEST)
    assert out_odd.shape == (1, C_OUT, 8, 8), out_odd.shape
    assert jnp.allclose(out_odd, ref_odd, atol=1e-4, rtol=1e-4)

    print("KERNEL_OK")
</pallas_src>

<mosaic_0001>
module attributes {stable_mosaic.version = 11 : i64} {
  func.func @_conv1x1_kernel(%arg0: i32, %arg1: i32, %arg2: i32, %arg3: memref<256x256xf32, #tpu.memory_space<vmem>>, %arg4: memref<1x256x64xf32, #tpu.memory_space<vmem>>, %arg5: memref<1x256x64xf32, #tpu.memory_space<vmem>>) attributes {dimension_semantics = [#tpu.dimension_semantics<parallel>, #tpu.dimension_semantics<parallel>, #tpu.dimension_semantics<parallel>], iteration_bounds = array<i64: 2, 2, 1>, scalar_prefetch = 0 : i64, scratch_operands = 0 : i64, tpu.core_type = #tpu.core_type<tc>, window_params = [{transform_indices = @transform_0, window_bounds = array<i64: 256, 256>}, {transform_indices = @transform_1, window_bounds = array<i64: 1, 256, 64>}, {transform_indices = @transform_2, window_bounds = array<i64: 1, 256, 64>}]} {
    %c0 = arith.constant 0 : index
    %c0_0 = arith.constant 0 : index
    %0 = vector.load %arg3[%c0, %c0_0] : memref<256x256xf32, #tpu.memory_space<vmem>>, vector<256x256xf32>
    %c0_1 = arith.constant 0 : index
    %c0_2 = arith.constant 0 : index
    %c0_3 = arith.constant 0 : index
    %1 = vector.load %arg4[%c0_1, %c0_2, %c0_3] : memref<1x256x64xf32, #tpu.memory_space<vmem>>, vector<1x256x64xf32>
    %2 = vector.shape_cast %1 : vector<1x256x64xf32> to vector<256x64xf32>
    %cst = arith.constant dense<0.000000e+00> : vector<256x64xf32>
    %3 = tpu.matmul %0, %2, %cst {dimension_numbers = #tpu.dot_dimension_numbers<[1], [0], [0], [1], [0, 0, 1, 1], [], []>} : vector<256x256xf32>, vector<256x64xf32>, vector<256x64xf32> -> vector<256x64xf32>
    %c0_4 = arith.constant 0 : index
    %c0_5 = arith.constant 0 : index
    %c0_6 = arith.constant 0 : index
    %4 = vector.load %arg5[%c0_4, %c0_5, %c0_6] : memref<1x256x64xf32, #tpu.memory_space<vmem>>, vector<1x256x64xf32>
    %5 = vector.shape_cast %4 : vector<1x256x64xf32> to vector<256x64xf32>
    %6 = vector.shape_cast %3 : vector<256x64xf32> to vector<1x256x64xf32>
    tpu.vector_store %arg5[%c0_4, %c0_5, %c0_6], %6 {strides = array<i32>} : memref<1x256x64xf32, #tpu.memory_space<vmem>>, vector<1x256x64xf32>,
    return
  }
  func.func @transform_0(%arg0: i32, %arg1: i32, %arg2: i32) -> (i32, i32) {
    %c0_i32 = arith.constant 0 : i32
    %c0_i32_0 = arith.constant 0 : i32
    return %arg1, %c0_i32 : i32, i32
  }
  func.func @transform_1(%arg0: i32, %arg1: i32, %arg2: i32) -> (i32, i32, i32) {
    %c0_i32 = arith.constant 0 : i32
    %c0_i32_0 = arith.constant 0 : i32
    return %arg0, %c0_i32, %arg2 : i32, i32, i32
  }
  func.func @transform_2(%arg0: i32, %arg1: i32, %arg2: i32) -> (i32, i32, i32) {
    %c0_i32 = arith.constant 0 : i32
    return %arg0, %arg1, %arg2 : i32, i32, i32
  }
}

</mosaic_0001>

<bundles_post_ra>
// kernel: _conv1x1_matmul.1
= control target key start
LH: loop header
LB: loop body
LE: loop exit
PB: predicated region body
PF: predicated region fallthrough
CT: control target
= control target key end

     0   :  { %7 = vsyncpa [#allocation3], 0  ;;  %s1240_s0 = inlined_call_operand.hbm [shape: f32[512,256], index: 0, kind: input, shape index: {}]   ;;  %s1241_s1 = inlined_call_operand.vmem [shape: f32[2,256,64], index: 1, kind: input, shape index: {}]   ;;  %s1242_s2 = inlined_call_operand.vmem [shape: f32[2,512,64], index: 2, kind: output, shape index: {}]  }
   0x1   :  { %9 = vsyncpa [#allocation3 + $0x1], 0  ;;  %s958_s9 = smov 0   ;;  %s960_s10 = smov 0  }
   0x2   :  { %s962_s11 = smov 0   ;;  %s964_s12 = smov 0  }
   0x3   :  { %s966_s13 = smov 0   ;;  %s968_s14 = smov 0  }
   0x4   :  { %s970_s15 = smov 0   ;;  %s972_s16 = smov 0  }
   0x5 LB: > { %s718_s17 = sadd.s32 4294967295, %s939_s16   ;;  %s30_s18 = sadd.s32 1, %s931_s14  ;;  %s939_s16 = sphi %s972_s16, %s15_s16   ;;  %s935_s15 = sphi %s970_s15, %s1251_s15   ;;  %s931_s14 = sphi %s968_s14, %s1250_s14   ;;  %s927_s13 = sphi %s966_s13, %s1249_s13   ;;  %s923_s12 = sphi %s964_s12, %s1248_s12   ;;  %s919_s11 = sphi %s962_s11, %s1247_s11   ;;  %s915_s10 = sphi %s960_s10, %s1246_s10   ;;  %s911_s9 = sphi %s958_s9, %s1245_s9  }
   0x6   : > { %p32_p0 = scmp.ge.s32.totalorder %s30_s18, 2  ;;  %s34_s19 = sadd.s32 1, %s935_s15 }
   0x7   : > { %s41_s20 = sadd.s32 1, %s919_s11  ;;  %p48_p1 = scmp.ne.s32.totalorder %s919_s11, %s915_s10 }
   0x8   : > { %s1253_s18 = smov (%p32_p0, %s30_s18), 0  ;;  %s1255_s19 = smov (!%p32_p0, %s34_s19), %s935_s15 }
   0x9   : > { %s38_s21 = ssub.s32 %s931_s14, %s1253_s18  ;;  %p49_p2 = scmp.eq.s32.totalorder %s939_s16, 0 }
   0xa   : > { %p36_p3 = scmp.ge.s32.totalorder %s1255_s19, 2  ;;  %p39_p4 = scmp.eq.s32.totalorder %s38_s21, 0 }
   0xb   : > { %p1008_p5 = por %p49_p2, %p48_p1  ;;  %p54_p6 = scmp.ne.s32.totalorder %s915_s10, %s911_s9 }
   0xc   : > { %s1257_s19 = smov (%p36_p3, %s1255_s19), 0  ;;  %p55_p7 = scmp.eq.s32.totalorder %s718_s17, 0 }
   0xd   : > { %s1016_s23 = scalar_select %p39_p4, %s919_s11, %s41_s20  }
   0xe   : > { %p776_p8 = scmp.lt.s32.totalorder %s939_s16, 4  ;;  %s136_s24 = sand.u32 1, %s919_s11  }
   0xf   : > { %p1020_p9 = por %p55_p7, %p54_p6  ;;  %s722_s26 = sshll.u32 %s136_s24, 9 }
  0x10   : > { %s736_s27 = sshll.u32 %s931_s14, 9  ;;  %s140_s4 = scalar_lea.vmem [#allocation2], %s722_s26 }
  0x11   : > { %s146_s30 = scalar_lea.hbm %s1240_s0, %s736_s27  ;;  %s149_s5 = sshll.u32 %s140_s4, 4  ;;  %s150_s5 = int_to_ptr.vmem [resolvable:$true] %s149_s5 }
  0x12   : > { %s147_s3 = sshll.u32 %s146_s30, 4  ;;  %p773_p10 = pnand %p776_p8, %p1008_p5  ;;  %s148_s3 = int_to_ptr.hbm [resolvable:$true] %s147_s3 }
  0x13   : > { %p726_p11 = scmp.ge.s32.totalorder %s939_s16, 1  ;;  %p168_p12 = scmp.lt.s32.totalorder %s939_s16, 5 }
  0x14   : > { %s137_s6 = scalar_lea.sflag [#allocation3], %s136_s24  ;;  %s941_s7 = smov 256  }
  0x15   : > { %s942_s8 = smov 16   ;;  %p169_p13 = pnand %p726_p11, %p168_p12 }
  0x16   : > { %775 = dma.hbm_to_vmem [thread:$0]  (!%p773_p10), %s148_s3, 8192, %s150_s5, %s137_s6, %s941_s7, %s941_s7, %s942_s8  }
  0x17   : > { %172 = sbr.rel (%p169_p13) target bundleno = 322 (0x142), region = 28  ;;  %s174_s9 = sand.u32 (!%p169_p13), 1, %s915_s10  }
  0x18   : > { %s727_s17 = sshll.u32 (!%p169_p13), %s174_s9, 9  ;;  %s175_s20 = scalar_lea.sflag (!%p169_p13), [#allocation3], %s174_s9 }
  0x19   : > { %s1033_s21 = scalar_lea.vmem (!%p169_p13), [#allocation2], %s727_s17 }
  0x1c   : > { %906 = dma.done.wait (%p1020_p9), %s175_s20, 8192  }
  0x1d   : > { %908 = vsyncadd (%p1020_p9), %s175_s20, 4294959104  ;;  %p216_p0 = scmp.lt.s32.totalorder %s927_s13, 1  ;;  %v269_v32 = vld [vmem:[%s1033_s21 + $0x100] sm:$0xff]  ;;  %v270_v33 = vld [vmem:[%s1033_s21 + $0x108] sm:$0xff]  ;;  %s730_s25 = sshll.u32 %s923_s12, 5  ;;  %vm559_vm0 = vcmask 523264  }
  0x1e   : > { %v237_v34 = vld [vmem:[%s1033_s21] sm:$0xff]  ;;  %v238_v35 = vld [vmem:[%s1033_s21 + $0x8] sm:$0xff]  ;;  %v271_v36 = vld [vmem:[%s1033_s21 + $0x110] sm:$0xff]  ;;  %p227_p1 = scmp.lt.s32.totalorder %s730_s25, 63 }
  0x1f   : > { %s1259_s13 = smov (!%p216_p0, %s927_s13), 1  ;;  %v272_v37 = vld [vmem:[%s1033_s21 + $0x118] sm:$0xff]  ;;  %v239_v38 = vld [vmem:[%s1033_s21 + $0x10] sm:$0xff]  ;;  %v273_v40 = vld [vmem:[%s1033_s21 + $0x120] sm:$0xff] }
  0x20   : > { %s737_s22 = sshll.u32 %s1259_s13, 8  ;;  %v240_v39 = vld [vmem:[%s1033_s21 + $0x18] sm:$0xff]  ;;  %v274_v41 = vld [vmem:[%s1033_s21 + $0x128] sm:$0xff]  ;;  %v241_v42 = vld [vmem:[%s1033_s21 + $0x20] sm:$0xff]  ;;  %s1261_s25 = smov (!%p227_p1, %s730_s25), 63 }
  0x21   : > { %s1047_s27 = scalar_lea.vmem %s1241_s1, %s737_s22  ;;  %v242_v43 = vld [vmem:[%s1033_s21 + $0x28] sm:$0xff]  ;;  %v275_v44 = vld [vmem:[%s1033_s21 + $0x130] sm:$0xff]  ;;  %v276_v45 = vld [vmem:[%s1033_s21 + $0x138] sm:$0xff]  ;;  %s731_s28 = sshll.u32 %s1259_s13, 6 }
  0x22   : > { %v316_v0 = vld [vmem:[%s1047_s27 + $0x78] sm:$0xff]  ;;  %v315_v2 = vld [vmem:[%s1047_s27 + $0x70] sm:$0xff]  ;;  %v314_v4 = vld [vmem:[%s1047_s27 + $0x68] sm:$0xff]  ;;  %s233_s29 = sadd.s32 %s731_s28, %s1261_s25 }
  0x23   : > { %v332_v1 = vld [vmem:[%s1047_s27 + $0xf8] sm:$0xff]  ;;  %738 = vmatpush.msra.mxu2 %v316_v0  ;;  %v331_v3 = vld [vmem:[%s1047_s27 + $0xf0] sm:$0xff]  ;;  %v330_v5 = vld [vmem:[%s1047_s27 + $0xe8] sm:$0xff]  ;;  %333 = vmatpush.msra.mxu0 %v316_v0  ;;  %s732_s30 = sshll.u32 %s233_s29, 3 }
  0x24   : > { %754 = vmatpush.msra.mxu3 %v332_v1  ;;  %446 = vmatpush.msra.mxu1 %v332_v1  ;;  %v313_v6 = vld [vmem:[%s1047_s27 + $0x60] sm:$0xff]  ;;  %v312_v8 = vld [vmem:[%s1047_s27 + $0x58] sm:$0xff]  ;;  %v311_v10 = vld [vmem:[%s1047_s27 + $0x50] sm:$0xff]  ;;  %s1150_s4 = scalar_lea.vmem %s1242_s2, %s732_s30 }
  0x25   : > { %739 = vmatpush.msra.mxu2 %v315_v2  ;;  %v329_v7 = vld [vmem:[%s1047_s27 + $0xe0] sm:$0xff]  ;;  %334 = vmatpush.msra.mxu0 %v315_v2  ;;  %v328_v9 = vld [vmem:[%s1047_s27 + $0xd8] sm:$0xff]  ;;  %v327_v11 = vld [vmem:[%s1047_s27 + $0xd0] sm:$0xff] }
  0x26   : > { %755 = vmatpush.msra.mxu3 %v331_v3  ;;  %447 = vmatpush.msra.mxu1 %v331_v3  ;;  %v310_v12 = vld [vmem:[%s1047_s27 + $0x48] sm:$0xff]  ;;  %v309_v14 = vld [vmem:[%s1047_s27 + $0x40] sm:$0xff]  ;;  %v308_v16 = vld [vmem:[%s1047_s27 + $0x38] sm:$0xff] }
  0x27   : > { %740 = vmatpush.msra.mxu2 %v314_v4  ;;  %335 = vmatpush.msra.mxu0 %v314_v4  ;;  %v326_v13 = vld [vmem:[%s1047_s27 + $0xc8] sm:$0xff]  ;;  %v325_v15 = vld [vmem:[%s1047_s27 + $0xc0] sm:$0xff]  ;;  %v324_v17 = vld [vmem:[%s1047_s27 + $0xb8] sm:$0xff] }
  0x28   : > { %756 = vmatpush.msra.mxu3 %v330_v5  ;;  %448 = vmatpush.msra.mxu1 %v330_v5  ;;  %v307_v18 = vld [vmem:[%s1047_s27 + $0x30] sm:$0xff]  ;;  %v306_v20 = vld [vmem:[%s1047_s27 + $0x28] sm:$0xff]  ;;  %v305_v22 = vld [vmem:[%s1047_s27 + $0x20] sm:$0xff] }
  0x29   : > { %741 = vmatpush.msra.mxu2 %v313_v6  ;;  %336 = vmatpush.msra.mxu0 %v313_v6  ;;  %v323_v19 = vld [vmem:[%s1047_s27 + $0xb0] sm:$0xff]  ;;  %v322_v21 = vld [vmem:[%s1047_s27 + $0xa8] sm:$0xff]  ;;  %v321_v23 = vld [vmem:[%s1047_s27 + $0xa0] sm:$0xff] }
  0x2a   : > { %757 = vmatpush.msra.mxu3 %v329_v7  ;;  %449 = vmatpush.msra.mxu1 %v329_v7  ;;  %v304_v24 = vld [vmem:[%s1047_s27 + $0x18] sm:$0xff]  ;;  %v303_v26 = vld [vmem:[%s1047_s27 + $0x10] sm:$0xff]  ;;  %v302_v28 = vld [vmem:[%s1047_s27 + $0x8] sm:$0xff] }
  0x2b   : > { %742 = vmatpush.msra.mxu2 %v312_v8  ;;  %337 = vmatpush.msra.mxu0 %v312_v8  ;;  %v320_v25 = vld [vmem:[%s1047_s27 + $0x98] sm:$0xff]  ;;  %v319_v27 = vld [vmem:[%s1047_s27 + $0x90] sm:$0xff]  ;;  %v318_v29 = vld [vmem:[%s1047_s27 + $0x88] sm:$0xff] }
  0x2c   : > { %758 = vmatpush.msra.mxu3 %v328_v9  ;;  %450 = vmatpush.msra.mxu1 %v328_v9  ;;  %v301_v30 = vld [vmem:[%s1047_s27] sm:$0xff]  ;;  %v243_v46 = vld [vmem:[%s1033_s21 + $0x30] sm:$0xff]  ;;  %v244_v47 = vld [vmem:[%s1033_s21 + $0x38] sm:$0xff] }
  0x2d   : > { %743 = vmatpush.msra.mxu2 %v311_v10  ;;  %338 = vmatpush.msra.mxu0 %v311_v10  ;;  %v317_v31 = vld [vmem:[%s1047_s27 + $0x80] sm:$0xff]  ;;  %v278_v49 = vld [vmem:[%s1033_s21 + $0x148] sm:$0xff]  ;;  %v279_v52 = vld [vmem:[%s1033_s21 + $0x150] sm:$0xff] }
  0x2e   : > { %759 = vmatpush.msra.mxu3 %v327_v11  ;;  %451 = vmatpush.msra.mxu1 %v327_v11  ;;  %v277_v48 = vld [vmem:[%s1033_s21 + $0x140] sm:$0xff]  ;;  %v246_v51 = vld [vmem:[%s1033_s21 + $0x48] sm:$0xff]  ;;  %v280_v53 = vld [vmem:[%s1033_s21 + $0x158] sm:$0xff] }
  0x2f   : > { %744 = vmatpush.msra.mxu2 %v310_v12  ;;  %339 = vmatpush.msra.mxu0 %v310_v12  ;;  %v245_v50 = vld [vmem:[%s1033_s21 + $0x40] sm:$0xff]  ;;  %v247_v54 = vld [vmem:[%s1033_s21 + $0x50] sm:$0xff]  ;;  %v248_v55 = vld [vmem:[%s1033_s21 + $0x58] sm:$0xff] }
  0x30   : > { %760 = vmatpush.msra.mxu3 %v326_v13  ;;  %452 = vmatpush.msra.mxu1 %v326_v13  ;;  %v281_v56 = vld [vmem:[%s1033_s21 + $0x160] sm:$0xff]  ;;  %v282_v57 = vld [vmem:[%s1033_s21 + $0x168] sm:$0xff]  ;;  %v283_v60 = vld [vmem:[%s1033_s21 + $0x170] sm:$0xff] }
  0x31   : > { %745 = vmatpush.msra.mxu2 %v309_v14  ;;  %340 = vmatpush.msra.mxu0 %v309_v14  ;;  %v249_v58 = vld [vmem:[%s1033_s21 + $0x60] sm:$0xff]  ;;  %v250_v59 = vld [vmem:[%s1033_s21 + $0x68] sm:$0xff]  ;;  %v284_v61 = vld [vmem:[%s1033_s21 + $0x178] sm:$0xff] }
  0x32   : > { %761 = vmatpush.msra.mxu3 %v325_v15  ;;  %453 = vmatpush.msra.mxu1 %v325_v15  ;;  %v251_v62 = vld [vmem:[%s1033_s21 + $0x70] sm:$0xff]  ;;  %v252_v63 = vld [vmem:[%s1033_s21 + $0x78] sm:$0xff]  ;;  %v285_v0 = vld [vmem:[%s1033_s21 + $0x180] sm:$0xff] }
  0x33   : > { %746 = vmatpush.msra.mxu2 %v308_v16  ;;  %341 = vmatpush.msra.mxu0 %v308_v16  ;;  %v286_v1 = vld [vmem:[%s1033_s21 + $0x188] sm:$0xff]  ;;  %v253_v2 = vld [vmem:[%s1033_s21 + $0x80] sm:$0xff]  ;;  %v287_v4 = vld [vmem:[%s1033_s21 + $0x190] sm:$0xff] }
  0x34   : > { %762 = vmatpush.msra.mxu3 %v324_v17  ;;  %454 = vmatpush.msra.mxu1 %v324_v17  ;;  %v254_v3 = vld [vmem:[%s1033_s21 + $0x88] sm:$0xff]  ;;  %v288_v5 = vld [vmem:[%s1033_s21 + $0x198] sm:$0xff]  ;;  %v255_v6 = vld [vmem:[%s1033_s21 + $0x90] sm:$0xff] }
  0x35   : > { %747 = vmatpush.msra.mxu2 %v307_v18  ;;  %342 = vmatpush.msra.mxu0 %v307_v18  ;;  %v256_v7 = vld [vmem:[%s1033_s21 + $0x98] sm:$0xff]  ;;  %v289_v8 = vld [vmem:[%s1033_s21 + $0x1a0] sm:$0xff]  ;;  %v290_v9 = vld [vmem:[%s1033_s21 + $0x1a8] sm:$0xff] }
  0x36   : > { %763 = vmatpush.msra.mxu3 %v323_v19  ;;  %455 = vmatpush.msra.mxu1 %v323_v19  ;;  %v257_v10 = vld [vmem:[%s1033_s21 + $0xa0] sm:$0xff]  ;;  %v258_v11 = vld [vmem:[%s1033_s21 + $0xa8] sm:$0xff]  ;;  %v291_v12 = vld [vmem:[%s1033_s21 + $0x1b0] sm:$0xff] }
  0x37   : > { %748 = vmatpush.msra.mxu2 %v306_v20  ;;  %343 = vmatpush.msra.mxu0 %v306_v20  ;;  %v292_v13 = vld [vmem:[%s1033_s21 + $0x1b8] sm:$0xff]  ;;  %v259_v14 = vld [vmem:[%s1033_s21 + $0xb0] sm:$0xff]  ;;  %v293_v16 = vld [vmem:[%s1033_s21 + $0x1c0] sm:$0xff] }
  0x38   : > { %764 = vmatpush.msra.mxu3 %v322_v21  ;;  %456 = vmatpush.msra.mxu1 %v322_v21  ;;  %v260_v15 = vld [vmem:[%s1033_s21 + $0xb8] sm:$0xff]  ;;  %v294_v17 = vld [vmem:[%s1033_s21 + $0x1c8] sm:$0xff]  ;;  %v261_v18 = vld [vmem:[%s1033_s21 + $0xc0] sm:$0xff] }
  0x39   : > { %749 = vmatpush.msra.mxu2 %v305_v22  ;;  %344 = vmatpush.msra.mxu0 %v305_v22  ;;  %v262_v19 = vld [vmem:[%s1033_s21 + $0xc8] sm:$0xff]  ;;  %v295_v20 = vld [vmem:[%s1033_s21 + $0x1d0] sm:$0xff]  ;;  %v296_v21 = vld [vmem:[%s1033_s21 + $0x1d8] sm:$0xff] }
  0x3a   : > { %765 = vmatpush.msra.mxu3 %v321_v23  ;;  %457 = vmatpush.msra.mxu1 %v321_v23  ;;  %v263_v22 = vld [vmem:[%s1033_s21 + $0xd0] sm:$0xff]  ;;  %v264_v23 = vld [vmem:[%s1033_s21 + $0xd8] sm:$0xff] }
  0x3b   : > { %750 = vmatpush.msra.mxu2 %v304_v24  ;;  %345 = vmatpush.msra.mxu0 %v304_v24  ;;  %v297_v24 = vld [vmem:[%s1033_s21 + $0x1e0] sm:$0xff] }
  0x3c   : > { %766 = vmatpush.msra.mxu3 %v320_v25  ;;  %458 = vmatpush.msra.mxu1 %v320_v25  ;;  %v298_v25 = vld [vmem:[%s1033_s21 + $0x1e8] sm:$0xff] }
  0x3d   : > { %751 = vmatpush.msra.mxu2 %v303_v26  ;;  %346 = vmatpush.msra.mxu0 %v303_v26  ;;  %v265_v26 = vld [vmem:[%s1033_s21 + $0xe0] sm:$0xff] }
  0x3e   : > { %767 = vmatpush.msra.mxu3 %v319_v27  ;;  %459 = vmatpush.msra.mxu1 %v319_v27  ;;  %v266_v27 = vld [vmem:[%s1033_s21 + $0xe8] sm:$0xff] }
  0x3f   : > { %752 = vmatpush.msra.mxu2 %v302_v28  ;;  %347 = vmatpush.msra.mxu0 %v302_v28  ;;  %v299_v28 = vld [vmem:[%s1033_s21 + $0x1f0] sm:$0xff] }
  0x40   : > { %768 = vmatpush.msra.mxu3 %v318_v29  ;;  %460 = vmatpush.msra.mxu1 %v318_v29  ;;  %v300_v29 = vld [vmem:[%s1033_s21 + $0x1f8] sm:$0xff] }
  0x41   : > { %753 = vmatpush.msra.mxu2 %v301_v30  ;;  %348 = vmatpush.msra.mxu0 %v301_v30  ;;  %v267_v30 = vld [vmem:[%s1033_s21 + $0xf0] sm:$0xff] }
  0x42   : > { %769 = vmatpush.msra.mxu3 %v317_v31  ;;  %397 = vmatmul.f32.vlgmr.msra.gmra.mxu2 %v269_v32 }
  0x43   : > { %510 = vmatmul.f32.vlgmr.msra.gmra.mxu3 %v270_v33  ;;  %461 = vmatpush.msra.mxu1 %v317_v31  ;;  %v268_v31 = vld [vmem:[%s1033_s21 + $0xf8] sm:$0xff] }
  0x44   : > { %349 = vmatmul.f32.vlgmr.msra.gmra.mxu0 %v237_v34  ;;  %462 = vmatmul.f32.vlgmr.msra.gmra.mxu1 %v238_v35 }
  0x4a   : > { %400 = vmatmul.f32.gmra.mxu2 %v271_v36 }
  0x4b   : > { %513 = vmatmul.f32.gmra.mxu3 %v272_v37 }
  0x4c   : > { %352 = vmatmul.f32.gmra.mxu0 %v239_v38  ;;  %465 = vmatmul.f32.gmra.mxu1 %v240_v39 }
  0x52   : > { %403 = vmatmul.f32.gmra.mxu2 %v273_v40 }
  0x53   : > { %516 = vmatmul.f32.gmra.mxu3 %v274_v41 }
  0x54   : > { %355 = vmatmul.f32.gmra.mxu0 %v241_v42  ;;  %468 = vmatmul.f32.gmra.mxu1 %v242_v43 }
  0x5a   : > { %406 = vmatmul.f32.gmra.mxu2 %v275_v44 }
  0x5b   : > { %519 = vmatmul.f32.gmra.mxu3 %v276_v45 }
  0x5c   : > { %358 = vmatmul.f32.gmra.mxu0 %v243_v46  ;;  %471 = vmatmul.f32.gmra.mxu1 %v244_v47 }
  0x62   : > { %409 = vmatmul.f32.gmra.mxu2 %v277_v48 }
  0x63   : > { %522 = vmatmul.f32.gmra.mxu3 %v278_v49 }
  0x64   : > { %361 = vmatmul.f32.gmra.mxu0 %v245_v50  ;;  %474 = vmatmul.f32.gmra.mxu1 %v246_v51 }
  0x6a   : > { %412 = vmatmul.f32.gmra.mxu2 %v279_v52 }
  0x6b   : > { %525 = vmatmul.f32.gmra.mxu3 %v280_v53 }
  0x6c   : > { %364 = vmatmul.f32.gmra.mxu0 %v247_v54  ;;  %477 = vmatmul.f32.gmra.mxu1 %v248_v55 }
  0x72   : > { %415 = vmatmul.f32.gmra.mxu2 %v281_v56 }
  0x73   : > { %528 = vmatmul.f32.gmra.mxu3 %v282_v57 }
  0x74   : > { %367 = vmatmul.f32.gmra.mxu0 %v249_v58  ;;  %480 = vmatmul.f32.gmra.mxu1 %v250_v59 }
  0x7a   : > { %418 = vmatmul.f32.gmra.mxu2 %v283_v60 }
  0x7b   : > { %531 = vmatmul.f32.gmra.mxu3 %v284_v61 }
  0x7c   : > { %370 = vmatmul.f32.gmra.mxu0 %v251_v62  ;;  %483 = vmatmul.f32.gmra.mxu1 %v252_v63 }
  0x82   : > { %421 = vmatmul.f32.gmra.mxu2 %v285_v0 }
  0x83   : > { %534 = vmatmul.f32.gmra.mxu3 %v286_v1 }
  0x84   : > { %373 = vmatmul.f32.gmra.mxu0 %v253_v2  ;;  %486 = vmatmul.f32.gmra.mxu1 %v254_v3 }
  0x8a   : > { %424 = vmatmul.f32.gmra.mxu2 %v287_v4 }
  0x8b   : > { %537 = vmatmul.f32.gmra.mxu3 %v288_v5 }
  0x8c   : > { %376 = vmatmul.f32.gmra.mxu0 %v255_v6  ;;  %489 = vmatmul.f32.gmra.mxu1 %v256_v7 }
  0x92   : > { %427 = vmatmul.f32.gmra.mxu2 %v289_v8 }
  0x93   : > { %540 = vmatmul.f32.gmra.mxu3 %v290_v9 }
  0x94   : > { %379 = vmatmul.f32.gmra.mxu0 %v257_v10  ;;  %492 = vmatmul.f32.gmra.mxu1 %v258_v11 }
  0x9a   : > { %430 = vmatmul.f32.gmra.mxu2 %v291_v12 }
  0x9b   : > { %543 = vmatmul.f32.gmra.mxu3 %v292_v13 }
  0x9c   : > { %382 = vmatmul.f32.gmra.mxu0 %v259_v14  ;;  %495 = vmatmul.f32.gmra.mxu1 %v260_v15 }
  0xa2   : > { %433 = vmatmul.f32.gmra.mxu2 %v293_v16 }
  0xa3   : > { %546 = vmatmul.f32.gmra.mxu3 %v294_v17 }
  0xa4   : > { %385 = vmatmul.f32.gmra.mxu0 %v261_v18  ;;  %498 = vmatmul.f32.gmra.mxu1 %v262_v19 }
  0xaa   : > { %436 = vmatmul.f32.gmra.mxu2 %v295_v20 }
  0xab   : > { %549 = vmatmul.f32.gmra.mxu3 %v296_v21 }
  0xac   : > { %388 = vmatmul.f32.gmra.mxu0 %v263_v22  ;;  %501 = vmatmul.f32.gmra.mxu1 %v264_v23 }
  0xb2   : > { %439 = vmatmul.f32.gmra.mxu2 %v297_v24 }
  0xb3   : > { %552 = vmatmul.f32.gmra.mxu3 %v298_v25 }
  0xb4   : > { %391 = vmatmul.f32.gmra.mxu0 %v265_v26  ;;  %504 = vmatmul.f32.gmra.mxu1 %v266_v27 }
  0xba   : > { %442 = vmatmul.f32.gmra.mxu2 %v299_v28 }
  0xbb   : > { %555 = vmatmul.f32.gmra.mxu3 %v300_v29 }
  0xbc   : > { %394 = vmatmul.f32.gmra.mxu0 %v267_v30  ;;  %507 = vmatmul.f32.gmra.mxu1 %v268_v31 }
  0xc1   : > { %v350_v32 = vpop.f32.mrf.mxu0  ;;  %v463_v33 = vpop.f32.mrf.mxu1 }
  0xc2   : > { %v464_v34 = vadd.f32 %v463_v33, %v350_v32 }
  0xc4   : > { %560 = vst.msk [vmem:[%s1150_s4] sm:$0xff] %vm559_vm0, %v464_v34 }
  0xc5   : > { %v398_v35 = vpop.f32.mrf.mxu2 }
  0xc6   : > { %v511_v36 = vpop.f32.mrf.mxu3 }
  0xc7   : > { %v512_v37 = vadd.f32 %v511_v36, %v398_v35 }
  0xc9   : > { %576 = vst.msk [vmem:[%s1150_s4 + $0x80] sm:$0xff] %vm559_vm0, %v512_v37  ;;  %v353_v38 = vpop.f32.mrf.mxu0  ;;  %v466_v39 = vpop.f32.mrf.mxu1 }
  0xca   : > { %v467_v40 = vadd.f32 %v466_v39, %v353_v38 }
  0xcc   : > { %561 = vst.msk [vmem:[%s1150_s4 + $0x8] sm:$0xff] %vm559_vm0, %v467_v40 }
  0xcd   : > { %v401_v41 = vpop.f32.mrf.mxu2 }
  0xce   : > { %v514_v42 = vpop.f32.mrf.mxu3 }
  0xcf   : > { %v515_v43 = vadd.f32 %v514_v42, %v401_v41 }
  0xd1   : > { %577 = vst.msk [vmem:[%s1150_s4 + $0x88] sm:$0xff] %vm559_vm0, %v515_v43  ;;  %v356_v44 = vpop.f32.mrf.mxu0  ;;  %v469_v45 = vpop.f32.mrf.mxu1 }
  0xd2   : > { %v470_v46 = vadd.f32 %v469_v45, %v356_v44 }
  0xd4   : > { %562 = vst.msk [vmem:[%s1150_s4 + $0x10] sm:$0xff] %vm559_vm0, %v470_v46 }
  0xd5   : > { %v404_v47 = vpop.f32.mrf.mxu2 }
  0xd6   : > { %v517_v48 = vpop.f32.mrf.mxu3 }
  0xd7   : > { %v518_v49 = vadd.f32 %v517_v48, %v404_v47 }
  0xd9   : > { %578 = vst.msk [vmem:[%s1150_s4 + $0x90] sm:$0xff] %vm559_vm0, %v518_v49  ;;  %v359_v50 = vpop.f32.mrf.mxu0  ;;  %v472_v51 = vpop.f32.mrf.mxu1 }
  0xda   : > { %v473_v52 = vadd.f32 %v472_v51, %v359_v50 }
  0xdc   : > { %563 = vst.msk [vmem:[%s1150_s4 + $0x18] sm:$0xff] %vm559_vm0, %v473_v52 }
  0xdd   : > { %v407_v53 = vpop.f32.mrf.mxu2 }
  0xde   : > { %v520_v54 = vpop.f32.mrf.mxu3 }
  0xdf   : > { %v521_v55 = vadd.f32 %v520_v54, %v407_v53 }
  0xe1   : > { %579 = vst.msk [vmem:[%s1150_s4 + $0x98] sm:$0xff] %vm559_vm0, %v521_v55  ;;  %v362_v56 = vpop.f32.mrf.mxu0  ;;  %v475_v57 = vpop.f32.mrf.mxu1 }
  0xe2   : > { %v476_v58 = vadd.f32 %v475_v57, %v362_v56 }
  0xe4   : > { %564 = vst.msk [vmem:[%s1150_s4 + $0x20] sm:$0xff] %vm559_vm0, %v476_v58 }
  0xe5   : > { %v410_v59 = vpop.f32.mrf.mxu2 }
  0xe6   : > { %v523_v60 = vpop.f32.mrf.mxu3 }
  0xe7   : > { %v524_v61 = vadd.f32 %v523_v60, %v410_v59 }
  0xe9   : > { %580 = vst.msk [vmem:[%s1150_s4 + $0xa0] sm:$0xff] %vm559_vm0, %v524_v61  ;;  %v365_v62 = vpop.f32.mrf.mxu0  ;;  %v478_v63 = vpop.f32.mrf.mxu1 }
  0xea   : > { %v479_v0 = vadd.f32 %v478_v63, %v365_v62 }
  0xec   : > { %565 = vst.msk [vmem:[%s1150_s4 + $0x28] sm:$0xff] %vm559_vm0, %v479_v0 }
  0xed   : > { %v413_v1 = vpop.f32.mrf.mxu2 }
  0xee   : > { %v526_v2 = vpop.f32.mrf.mxu3 }
  0xef   : > { %v527_v3 = vadd.f32 %v526_v2, %v413_v1 }
  0xf1   : > { %581 = vst.msk [vmem:[%s1150_s4 + $0xa8] sm:$0xff] %vm559_vm0, %v527_v3  ;;  %v368_v4 = vpop.f32.mrf.mxu0  ;;  %v481_v5 = vpop.f32.mrf.mxu1 }
  0xf2   : > { %v482_v6 = vadd.f32 %v481_v5, %v368_v4 }
  0xf4   : > { %566 = vst.msk [vmem:[%s1150_s4 + $0x30] sm:$0xff] %vm559_vm0, %v482_v6 }
  0xf5   : > { %v416_v7 = vpop.f32.mrf.mxu2 }
  0xf6   : > { %v529_v8 = vpop.f32.mrf.mxu3 }
  0xf7   : > { %v530_v9 = vadd.f32 %v529_v8, %v416_v7 }
  0xf9   : > { %582 = vst.msk [vmem:[%s1150_s4 + $0xb0] sm:$0xff] %vm559_vm0, %v530_v9  ;;  %v371_v10 = vpop.f32.mrf.mxu0  ;;  %v484_v11 = vpop.f32.mrf.mxu1 }
  0xfa   : > { %v485_v12 = vadd.f32 %v484_v11, %v371_v10 }
  0xfc   : > { %567 = vst.msk [vmem:[%s1150_s4 + $0x38] sm:$0xff] %vm559_vm0, %v485_v12 }
  0xfd   : > { %v419_v13 = vpop.f32.mrf.mxu2 }
  0xfe   : > { %v532_v14 = vpop.f32.mrf.mxu3 }
  0xff   : > { %v533_v15 = vadd.f32 %v532_v14, %v419_v13 }
 0x101   : > { %583 = vst.msk [vmem:[%s1150_s4 + $0xb8] sm:$0xff] %vm559_vm0, %v533_v15  ;;  %v374_v16 = vpop.f32.mrf.mxu0  ;;  %v487_v17 = vpop.f32.mrf.mxu1 }
 0x102   : > { %v488_v18 = vadd.f32 %v487_v17, %v374_v16 }
 0x104   : > { %568 = vst.msk [vmem:[%s1150_s4 + $0x40] sm:$0xff] %vm559_vm0, %v488_v18 }
 0x105   : > { %v422_v19 = vpop.f32.mrf.mxu2 }
 0x106   : > { %v535_v20 = vpop.f32.mrf.mxu3 }
 0x107   : > { %v536_v21 = vadd.f32 %v535_v20, %v422_v19 }
 0x109   : > { %584 = vst.msk [vmem:[%s1150_s4 + $0xc0] sm:$0xff] %vm559_vm0, %v536_v21  ;;  %v377_v22 = vpop.f32.mrf.mxu0  ;;  %v490_v23 = vpop.f32.mrf.mxu1 }
 0x10a   : > { %v491_v24 = vadd.f32 %v490_v23, %v377_v22 }
 0x10c   : > { %569 = vst.msk [vmem:[%s1150_s4 + $0x48] sm:$0xff] %vm559_vm0, %v491_v24 }
 0x10d   : > { %v425_v25 = vpop.f32.mrf.mxu2 }
 0x10e   : > { %v538_v26 = vpop.f32.mrf.mxu3 }
 0x10f   : > { %v539_v27 = vadd.f32 %v538_v26, %v425_v25 }
 0x111   : > { %585 = vst.msk [vmem:[%s1150_s4 + $0xc8] sm:$0xff] %vm559_vm0, %v539_v27  ;;  %v380_v28 = vpop.f32.mrf.mxu0  ;;  %v493_v29 = vpop.f32.mrf.mxu1 }
 0x112   : > { %v494_v30 = vadd.f32 %v493_v29, %v380_v28 }
 0x114   : > { %570 = vst.msk [vmem:[%s1150_s4 + $0x50] sm:$0xff] %vm559_vm0, %v494_v30 }
 0x115   : > { %v428_v31 = vpop.f32.mrf.mxu2 }
 0x116   : > { %v541_v32 = vpop.f32.mrf.mxu3 }
 0x117   : > { %v542_v33 = vadd.f32 %v541_v32, %v428_v31 }
 0x119   : > { %586 = vst.msk [vmem:[%s1150_s4 + $0xd0] sm:$0xff] %vm559_vm0, %v542_v33  ;;  %v383_v34 = vpop.f32.mrf.mxu0  ;;  %v496_v35 = vpop.f32.mrf.mxu1 }
 0x11a   : > { %v497_v36 = vadd.f32 %v496_v35, %v383_v34 }
 0x11c   : > { %571 = vst.msk [vmem:[%s1150_s4 + $0x58] sm:$0xff] %vm559_vm0, %v497_v36 }
 0x11d   : > { %v431_v37 = vpop.f32.mrf.mxu2 }
 0x11e   : > { %v544_v38 = vpop.f32.mrf.mxu3 }
 0x11f   : > { %v545_v39 = vadd.f32 %v544_v38, %v431_v37 }
 0x121   : > { %587 = vst.msk [vmem:[%s1150_s4 + $0xd8] sm:$0xff] %vm559_vm0, %v545_v39  ;;  %v386_v40 = vpop.f32.mrf.mxu0  ;;  %v499_v41 = vpop.f32.mrf.mxu1 }
 0x122   : > { %v500_v42 = vadd.f32 %v499_v41, %v386_v40 }
 0x124   : > { %572 = vst.msk [vmem:[%s1150_s4 + $0x60] sm:$0xff] %vm559_vm0, %v500_v42 }
 0x125   : > { %v434_v43 = vpop.f32.mrf.mxu2 }
 0x126   : > { %v547_v44 = vpop.f32.mrf.mxu3 }
 0x127   : > { %v548_v45 = vadd.f32 %v547_v44, %v434_v43 }
 0x129   : > { %588 = vst.msk [vmem:[%s1150_s4 + $0xe0] sm:$0xff] %vm559_vm0, %v548_v45  ;;  %v389_v46 = vpop.f32.mrf.mxu0  ;;  %v502_v47 = vpop.f32.mrf.mxu1 }
 0x12a   : > { %v503_v48 = vadd.f32 %v502_v47, %v389_v46 }
 0x12c   : > { %573 = vst.msk [vmem:[%s1150_s4 + $0x68] sm:$0xff] %vm559_vm0, %v503_v48 }
 0x12d   : > { %v437_v49 = vpop.f32.mrf.mxu2 }
 0x12e   : > { %v550_v50 = vpop.f32.mrf.mxu3 }
 0x12f   : > { %v551_v51 = vadd.f32 %v550_v50, %v437_v49 }
 0x131   : > { %589 = vst.msk [vmem:[%s1150_s4 + $0xe8] sm:$0xff] %vm559_vm0, %v551_v51  ;;  %v392_v52 = vpop.f32.mrf.mxu0  ;;  %v505_v53 = vpop.f32.mrf.mxu1 }
 0x132   : > { %v506_v54 = vadd.f32 %v505_v53, %v392_v52 }
 0x134   : > { %574 = vst.msk [vmem:[%s1150_s4 + $0x70] sm:$0xff] %vm559_vm0, %v506_v54 }
 0x135   : > { %v440_v55 = vpop.f32.mrf.mxu2 }
 0x136   : > { %v553_v56 = vpop.f32.mrf.mxu3 }
 0x137   : > { %v554_v57 = vadd.f32 %v553_v56, %v440_v55 }
 0x139   : > { %590 = vst.msk [vmem:[%s1150_s4 + $0xf0] sm:$0xff] %vm559_vm0, %v554_v57  ;;  %v395_v58 = vpop.f32.mrf.mxu0  ;;  %v508_v59 = vpop.f32.mrf.mxu1 }
 0x13a   : > { %v509_v60 = vadd.f32 %v508_v59, %v395_v58 }
 0x13c   : > { %575 = vst.msk [vmem:[%s1150_s4 + $0x78] sm:$0xff] %vm559_vm0, %v509_v60 }
 0x13d   : > { %v443_v61 = vpop.f32.mrf.mxu2 }
 0x13e   : > { %v556_v62 = vpop.f32.mrf.mxu3 }
 0x13f   : > { %v557_v63 = vadd.f32 %v556_v62, %v443_v61 }
 0x141   : > { %591 = vst.msk [vmem:[%s1150_s4 + $0xf8] sm:$0xff] %vm559_vm0, %v557_v63 }
 0x142 PF: > { %s15_s16 = sadd.s32 1, %s939_s16   ;;  %s1245_s9 = smov %s915_s10 }
 0x143   : > { %p12_p2 = scmp.ge.s32.totalorder %s15_s16, 6   ;;  %s1246_s10 = smov %s919_s11 }
 0x144   : > { %s1247_s11 = smov %s1016_s23  ;;  %s1248_s12 = smov %s931_s14 }
 0x145   : > { %s1249_s13 = smov %s935_s15  ;;  %s1250_s14 = smov %s1253_s18 }
 0x146   : > { %s1251_s15 = smov %s1257_s19  ;;  %14 = sbr.rel (!%p12_p2) target bundleno = 5 (0x5), region = 71 }
 0x14b   :  { %628 = vsyncpa [#allocation3], 1 }
 0x14c   :  { %630 = vsyncpa [#allocation3 + $0x1], 1 }

</bundles_post_ra>
